<compile_context>
chip_gen: v6e
topology: v6e:2x2x1
jax: 0.10.0
libtpu: 0.0.40
codegen_flags: <defaults>
</compile_context>

<pallas_src>
import functools
import math

import jax
import jax.numpy as jnp
from jax.experimental import pallas as pl
from jax.experimental.pallas import tpu as pltpu


# ------------------------------------------------------------------ config --
class Config:
    num_hidden_layers = 2
    hidden_size = 32
    num_attention_heads = 4
    intermediate_size = 64
    layer_norm_eps = 1e-5
    lookahead_split_layers = 1  # switch to lookahead=0 mask at this layer
    is_decoder = False
    add_cross_attention = False


# ---------------------------------------------------------------- helpers ---
def _layer_norm(x, gamma, beta, eps):
    x = x.astype(jnp.float32)
    mu = jnp.mean(x, axis=-1, keepdims=True)
    var = jnp.mean((x - mu) ** 2, axis=-1, keepdims=True)
    return (x - mu) * jax.lax.rsqrt(var + eps) * gamma + beta


def _gelu_exact(x):
    # exact (erf) GELU, matching torch.nn.functional.gelu default
    return 0.5 * x * (1.0 + jax.lax.erf(x * 0.7071067811865476))


# ---------------------------------------------------------------- kernel ----
def encoder_kernel(
    hs_ref, mask_ref,
    wqkv_ref, bqkv_ref, wo_ref, wi_ref, bi_ref, wd_ref, bvec_ref,
    out_ref,
    state_ref, ctx_ref,
    *, num_heads, head_dim, split_layer, eps,
):
    """One (batch b, layer l) grid step; hidden state carried in state_ref."""
    l = pl.program_id(1)
    num_layers = pl.num_programs(1)
    H = num_heads * head_dim
    S = state_ref.shape[0]
    NEG = jnp.float32(-1e9)            # finite (bf16-safe) mask value
    cdt = wqkv_ref.dtype               # MXU operand dtype (bfloat16)

    @pl.when(l == 0)
    def _():
        state_ref[...] = hs_ref[0].astype(jnp.float32)

    x = state_ref[...]                 # (S, H) f32, carried across layers

    # ---- additive attention-mask bias built in-kernel (cheap VPU work) -----
    key_mask = mask_ref[0]             # (1, S): 1 = attend, 0 = padding
    bias = jnp.broadcast_to(jnp.where(key_mask > 0.5, 0.0, NEG), (S, S))
    if split_layer is not None:
        q_idx = jax.lax.broadcasted_iota(jnp.int32, (S, S), 0)
        k_idx = jax.lax.broadcasted_iota(jnp.int32, (S, S), 1)
        causal = jnp.where(k_idx <= q_idx, 0.0, NEG)       # lookahead = 0
        la = (l >= split_layer).astype(jnp.float32)        # runtime switch
        bias = bias + la * causal

    vecs = bvec_ref[0]                 # (6, H): bo, g1, b1, bd, g2, b2
    bo, g1, b1 = vecs[0:1], vecs[1:2], vecs[2:3]
    bd, g2, b2 = vecs[3:4], vecs[4:5], vecs[5:6]

    # ---- fused QKV projection; 1/sqrt(hd) pre-folded into Q weights --------
    qkv = (jnp.dot(x.astype(cdt), wqkv_ref[0],
                   preferred_element_type=jnp.float32)
           + bqkv_ref[0]).astype(cdt)  # (S, 3H)

    # ---- per-head attention; contexts packed into ctx_ref ------------------
    for h in range(num_heads):         # static loop; heavy Wo matmul hoisted
        lo = h * head_dim
        qh = qkv[:, lo:lo + head_dim]
        kh = qkv[:, H + lo:H + lo + head_dim]
        vh = qkv[:, 2 * H + lo:2 * H + lo + head_dim]
        # q @ k^T via NT dot_general (K-transpose folded into MXU staging)
        s = jax.lax.dot_general(qh, kh, (((1,), (1,)), ((), ())),
                                preferred_element_type=jnp.float32)
        s = s + bias
        s = s - jnp.max(s, axis=-1, keepdims=True)
        p = jnp.exp(s)
        p = p * pl.reciprocal(jnp.sum(p, axis=-1, keepdims=True), approx=True)
        ctx_ref[:, lo:lo + head_dim] = jnp.dot(
            p.astype(cdt), vh, preferred_element_type=jnp.float32).astype(cdt)

    # ---- ONE full-depth output projection (K = H, not K = head_dim) --------
    attn = jnp.dot(ctx_ref[...], wo_ref[0],
                   preferred_element_type=jnp.float32) + bo

    # ---- residual + LayerNorm (f32) ----
    h1 = _layer_norm(attn + x, g1, b1, eps)

    # ---- FFN: dense + GELU + dense + residual + LayerNorm ----
    inter = jnp.dot(h1.astype(cdt), wi_ref[0],
                    preferred_element_type=jnp.float32) + bi_ref[0]
    inter = _gelu_exact(inter)
    ffn = jnp.dot(inter.astype(cdt), wd_ref[0],
                  preferred_element_type=jnp.float32) + bd
    y = _layer_norm(ffn + h1, g2, b2, eps)

    state_ref[...] = y

    @pl.when(l == num_layers - 1)
    def _():
        out_ref[0] = y.astype(out_ref.dtype)


# ----------------------------------------------------------- mask helpers ---
def extended_attention_mask(attention_mask_2d, lookahead=None, dtype=jnp.float32):
    """JAX port of get_extended_attention_mask (used by the pure-JAX ref)."""
    B, S = attention_mask_2d.shape
    m = attention_mask_2d.astype(dtype)
    if lookahead is not None:
        tril = jnp.tril(jnp.ones((S, S), dtype), k=lookahead)
        ext = m[:, None, :] * tril[None, :, :]              # (B, S, S)
    else:
        ext = jnp.broadcast_to(m[:, None, :], (B, S, S))    # (B, S, S)
    return (1.0 - ext) * jnp.finfo(dtype).min


# -------------------------------------------------------- param packing -----
def pack_params(layer_params, head_dim, param_dtype=jnp.bfloat16):
    """Pack per-layer params: bf16 matmul weights, f32 bias/LN vectors."""
    scale = 1.0 / math.sqrt(head_dim)
    wqkv = jnp.stack([jnp.concatenate([p["wq"] * scale, p["wk"], p["wv"]], axis=1)
                      for p in layer_params]).astype(param_dtype)     # (L, H, 3H)
    bqkv = jnp.stack([jnp.concatenate([p["bq"] * scale, p["bk"], p["bv"]], axis=1)
                      for p in layer_params]).astype(jnp.float32)     # (L, 1, 3H)
    wo = jnp.stack([p["wo"] for p in layer_params]).astype(param_dtype)   # (L, H, H)
    wi = jnp.stack([p["wi"] for p in layer_params]).astype(param_dtype)   # (L, H, I)
    bi = jnp.stack([p["bi"] for p in layer_params]).astype(jnp.float32)   # (L, 1, I)
    wd = jnp.stack([p["wd"] for p in layer_params]).astype(param_dtype)   # (L, I, H)
    bvec = jnp.stack([jnp.concatenate([p["bo"], p["ln1_g"], p["ln1_b"],
                                       p["bd"], p["ln2_g"], p["ln2_b"]], axis=0)
                      for p in layer_params]).astype(jnp.float32)     # (L, 6, H)
    return dict(wqkv=wqkv, bqkv=bqkv, wo=wo, wi=wi, bi=bi, wd=wd, bvec=bvec)


def _vmem_limit_bytes(S, H, I):
    """2x per-layer weights (bf16, double-buffered) + activation working set."""
    per_layer_w = (3 * H * H + H * H + H * I + I * H) * 2
    per_layer_vec = (3 * H + I + 6 * H) * 4
    acts = (6 * S * H + 3 * S * S + S * 3 * H + S * I) * 4
    need = 2 * (per_layer_w + per_layer_vec) + acts + (4 << 20)
    return int(min(max(need, 16 << 20), 64 << 20))   # cap for v7x's 64 MiB


# ------------------------------------------------------------ encoder fwd ---
def subword_xlmr_encoder(hidden_states, attention_mask_2d, layer_params,
                         cfg: Config, param_dtype=jnp.bfloat16):
    """Forward of SubwordXLMRobertaEncoder (no cache / cross-attn / head_mask)."""
    B, S, H = hidden_states.shape
    L = cfg.num_hidden_layers
    nh = cfg.num_attention_heads
    hd = H // nh
    I = cfg.intermediate_size
    split = cfg.lookahead_split_layers

    packed = pack_params(layer_params, hd, param_dtype)
    mask3d = attention_mask_2d.astype(jnp.float32).reshape(B, 1, S)

    def per_layer(a):
        shape = (1,) + a.shape[1:]
        return pl.BlockSpec(shape, lambda b, l, _nd=a.ndim: (l,) + (0,) * (_nd - 1))

    in_specs = [
        pl.BlockSpec((1, S, H), lambda b, l: (b, 0, 0)),   # hidden states
        pl.BlockSpec((1, 1, S), lambda b, l: (b, 0, 0)),   # 2D key mask
        per_layer(packed["wqkv"]), per_layer(packed["bqkv"]),
        per_layer(packed["wo"]),
        per_layer(packed["wi"]), per_layer(packed["bi"]), per_layer(packed["wd"]),
        per_layer(packed["bvec"]),
    ]

    kernel = functools.partial(
        encoder_kernel, num_heads=nh, head_dim=hd, split_layer=split,
        eps=cfg.layer_norm_eps)

    return pl.pallas_call(
        kernel,
        out_shape=jax.ShapeDtypeStruct((B, S, H), hidden_states.dtype),
        grid_spec=pltpu.PrefetchScalarGridSpec(
            num_scalar_prefetch=0,
            grid=(B, L),                       # layer axis streams weights
            in_specs=in_specs,
            out_specs=pl.BlockSpec((1, S, H), lambda b, l: (b, 0, 0)),
            scratch_shapes=[pltpu.VMEM((S, H), jnp.float32),   # hidden carry
                            pltpu.VMEM((S, H), param_dtype)],  # attn context
        ),
        compiler_params=pltpu.CompilerParams(
            dimension_semantics=("parallel", "arbitrary"),
            vmem_limit_bytes=_vmem_limit_bytes(S, H, I),
        ),
    )(hidden_states, mask3d,
      packed["wqkv"], packed["bqkv"], packed["wo"],
      packed["wi"], packed["bi"], packed["wd"], packed["bvec"])


# ---------------------------------------------------------- pure-JAX ref ----
def _ref_layer(x, bias, p, cfg):
    nh = cfg.num_attention_heads
    B, S, H = x.shape
    hd = H // nh
    q = x @ p["wq"] + p["bq"]
    k = x @ p["wk"] + p["bk"]
    v = x @ p["wv"] + p["bv"]
    q = q.reshape(B, S, nh, hd).transpose(0, 2, 1, 3)
    k = k.reshape(B, S, nh, hd).transpose(0, 2, 1, 3)
    v = v.reshape(B, S, nh, hd).transpose(0, 2, 1, 3)
    s = jnp.einsum("bhqd,bhkd->bhqk", q, k) / math.sqrt(hd) + bias[:, None, :, :]
    pa = jax.nn.softmax(s, axis=-1)
    ctx = jnp.einsum("bhqk,bhkd->bhqd", pa, v).transpose(0, 2, 1, 3).reshape(B, S, H)
    ao = ctx @ p["wo"] + p["bo"]

    def ln(y, g, b):
        mu = y.mean(-1, keepdims=True)
        var = ((y - mu) ** 2).mean(-1, keepdims=True)
        return (y - mu) / jnp.sqrt(var + cfg.layer_norm_eps) * g + b

    h1 = ln(ao + x, p["ln1_g"], p["ln1_b"])
    pre = h1 @ p["wi"] + p["bi"]
    inter = 0.5 * pre * (1.0 + jax.lax.erf(pre / jnp.sqrt(2.0)))
    ff = inter @ p["wd"] + p["bd"]
    return ln(ff + h1, p["ln2_g"], p["ln2_b"])


def _ref_encoder(x, mask2d, layer_params, cfg):
    bias = extended_attention_mask(mask2d, None)
    for i in range(cfg.num_hidden_layers):
        if cfg.lookahead_split_layers is not None and i == cfg.lookahead_split_layers:
            bias = extended_attention_mask(mask2d, 0)
        x = _ref_layer(x, bias, layer_params[i], cfg)
    return x


# --------------------------------------------------------------- params -----
def init_layer_params(key, cfg: Config):
    H, I = cfg.hidden_size, cfg.intermediate_size
    ks = jax.random.split(key, 12)
    n = lambda k, s: (0.02 * jax.random.normal(k, s, jnp.float32))
    return {
        "wq": n(ks[0], (H, H)), "bq": n(ks[1], (1, H)),
        "wk": n(ks[2], (H, H)), "bk": n(ks[3], (1, H)),
        "wv": n(ks[4], (H, H)), "bv": n(ks[5], (1, H)),
        "wo": n(ks[6], (H, H)), "bo": n(ks[7], (1, H)),
        "ln1_g": jnp.ones((1, H), jnp.float32), "ln1_b": jnp.zeros((1, H), jnp.float32),
        "wi": n(ks[8], (H, I)), "bi": n(ks[9], (1, I)),
        "wd": n(ks[10], (I, H)), "bd": n(ks[11], (1, H)),
        "ln2_g": jnp.ones((1, H), jnp.float32), "ln2_b": jnp.zeros((1, H), jnp.float32),
    }


# ------------------------------------------------------------------ main ----
if __name__ == "__main__":
    cfg = Config()
    B, S, H = 2, 8, cfg.hidden_size

    key = jax.random.PRNGKey(0)
    k_x, k_mask, *k_layers = jax.random.split(key, 2 + cfg.num_hidden_layers)

    hidden_states = jax.random.normal(k_x, (B, S, H), jnp.float32)
    # attention mask: batch 0 all ones, batch 1 has last 2 tokens padded out
    attention_mask = jnp.concatenate(
        [jnp.ones((1, S), jnp.float32),
         jnp.concatenate([jnp.ones((1, S - 2)), jnp.zeros((1, 2))], axis=1)],
        axis=0,
    )

    layer_params = [init_layer_params(k_layers[i], cfg)
                    for i in range(cfg.num_hidden_layers)]

    out = subword_xlmr_encoder(hidden_states, attention_mask, layer_params, cfg)
    out = jax.block_until_ready(out)

    ref = _ref_encoder(hidden_states, attention_mask, layer_params, cfg)
    assert out.shape == (B, S, H)
    # tolerance accounts for bf16 MXU operands + EUP approximate reciprocal;
    # accumulation / LayerNorm / softmax are f32.
    max_err = float(jnp.max(jnp.abs(out - ref)))
    assert jnp.allclose(out, ref, atol=5e-2, rtol=5e-2), \
        f"mismatch vs pure-JAX reference (max |err| = {max_err})"

    # TODO(synk): cross-attention / past_key_values / gradient checkpointing /
    # head_mask / output_attentions branches of the PyTorch forward are unused
    # defaults and not ported.

    print("KERNEL_OK")
</pallas_src>

<mosaic_0001>
module attributes {stable_mosaic.version = 11 : i64} {
  func.func @encoder_kernel(%arg0: i32, %arg1: i32, %arg2: memref<1x8x32xf32, #tpu.memory_space<vmem>>, %arg3: memref<1x1x8xf32, #tpu.memory_space<vmem>>, %arg4: memref<1x32x96xbf16, #tpu.memory_space<vmem>>, %arg5: memref<1x1x96xf32, #tpu.memory_space<vmem>>, %arg6: memref<1x32x32xbf16, #tpu.memory_space<vmem>>, %arg7: memref<1x32x64xbf16, #tpu.memory_space<vmem>>, %arg8: memref<1x1x64xf32, #tpu.memory_space<vmem>>, %arg9: memref<1x64x32xbf16, #tpu.memory_space<vmem>>, %arg10: memref<1x6x32xf32, #tpu.memory_space<vmem>>, %arg11: memref<1x8x32xf32, #tpu.memory_space<vmem>>, %arg12: memref<8x32xf32, #tpu.memory_space<vmem>>, %arg13: memref<8x32xbf16, #tpu.memory_space<vmem>>) attributes {dimension_semantics = [#tpu.dimension_semantics<parallel>, #tpu.dimension_semantics<arbitrary>], iteration_bounds = array<i64: 2, 2>, scalar_prefetch = 0 : i64, scratch_operands = 2 : i64, tpu.core_type = #tpu.core_type<tc>, window_params = [{transform_indices = @transform_0, window_bounds = array<i64: 1, 8, 32>}, {transform_indices = @transform_1, window_bounds = array<i64: 1, 1, 8>}, {transform_indices = @transform_2, window_bounds = array<i64: 1, 32, 96>}, {transform_indices = @transform_3, window_bounds = array<i64: 1, 1, 96>}, {transform_indices = @transform_4, window_bounds = array<i64: 1, 32, 32>}, {transform_indices = @transform_5, window_bounds = array<i64: 1, 32, 64>}, {transform_indices = @transform_6, window_bounds = array<i64: 1, 1, 64>}, {transform_indices = @transform_7, window_bounds = array<i64: 1, 64, 32>}, {transform_indices = @transform_8, window_bounds = array<i64: 1, 6, 32>}, {transform_indices = @transform_9, window_bounds = array<i64: 1, 8, 32>}]} {
    %c0_i32 = arith.constant 0 : i32
    %0 = arith.cmpi eq, %arg1, %c0_i32 : i32
    %1 = arith.extui %0 : i1 to i32
    %c0_i32_0 = arith.constant 0 : i32
    %2 = arith.cmpi ne, %1, %c0_i32_0 : i32
    scf.if %2 {
      %c0_74 = arith.constant 0 : index
      %c0_75 = arith.constant 0 : index
      %c0_76 = arith.constant 0 : index
      %196 = vector.load %arg2[%c0_74, %c0_75, %c0_76] : memref<1x8x32xf32, #tpu.memory_space<vmem>>, vector<1x8x32xf32>
      %197 = vector.shape_cast %196 : vector<1x8x32xf32> to vector<8x32xf32>
      %c0_77 = arith.constant 0 : index
      %c0_78 = arith.constant 0 : index
      %198 = vector.load %arg12[%c0_77, %c0_78] : memref<8x32xf32, #tpu.memory_space<vmem>>, vector<8x32xf32>
      tpu.vector_store %arg12[%c0_77, %c0_78], %197 {strides = array<i32>} : memref<8x32xf32, #tpu.memory_space<vmem>>, vector<8x32xf32>,
    } else {
    }
    %c0 = arith.constant 0 : index
    %c0_1 = arith.constant 0 : index
    %3 = vector.load %arg12[%c0, %c0_1] : memref<8x32xf32, #tpu.memory_space<vmem>>, vector<8x32xf32>
    %c0_2 = arith.constant 0 : index
    %c0_3 = arith.constant 0 : index
    %c0_4 = arith.constant 0 : index
    %4 = vector.load %arg3[%c0_2, %c0_3, %c0_4] : memref<1x1x8xf32, #tpu.memory_space<vmem>>, vector<1x1x8xf32>
    %5 = vector.shape_cast %4 : vector<1x1x8xf32> to vector<1x8xf32>
    %cst = arith.constant 5.000000e-01 : f32
    %6 = vector.broadcast %cst : f32 to vector<1x8xf32>
    %7 = arith.cmpf ogt, %5, %6 : vector<1x8xf32>
    %cst_5 = arith.constant 0.000000e+00 : f32
    %cst_6 = arith.constant -1.000000e+09 : f32
    %8 = vector.broadcast %cst_5 : f32 to vector<1x8xf32>
    %9 = vector.broadcast %cst_6 : f32 to vector<1x8xf32>
    %10 = arith.select %7, %8, %9 : vector<1x8xi1>, vector<1x8xf32>
    %11 = vector.shape_cast %10 : vector<1x8xf32> to vector<1x8xf32>
    %12 = vector.broadcast %11 : vector<1x8xf32> to vector<8x8xf32>
    %13 = tpu.iota {dimensions = array<i32: 0>} : vector<8x8xi32>
    %14 = tpu.iota {dimensions = array<i32: 1>} : vector<8x8xi32>
    %15 = arith.cmpi sle, %14, %13 : vector<8x8xi32>
    %cst_7 = arith.constant 0.000000e+00 : f32
    %cst_8 = arith.constant -1.000000e+09 : f32
    %16 = vector.broadcast %cst_7 : f32 to vector<8x8xf32>
    %17 = vector.broadcast %cst_8 : f32 to vector<8x8xf32>
    %18 = arith.select %15, %16, %17 : vector<8x8xi1>, vector<8x8xf32>
    %c1_i32 = arith.constant 1 : i32
    %19 = arith.cmpi sge, %arg1, %c1_i32 : i32
    %20 = arith.extui %19 : i1 to i32
    %21 = arith.sitofp %20 : i32 to f32
    %22 = vector.broadcast %21 : f32 to vector<8x8xf32>
    %23 = arith.mulf %22, %18 : vector<8x8xf32>
    %24 = arith.addf %12, %23 : vector<8x8xf32>
    %c0_9 = arith.constant 0 : index
    %c0_10 = arith.constant 0 : index
    %c0_11 = arith.constant 0 : index
    %25 = vector.load %arg10[%c0_9, %c0_10, %c0_11] : memref<1x6x32xf32, #tpu.memory_space<vmem>>, vector<1x6x32xf32>
    %26 = vector.shape_cast %25 : vector<1x6x32xf32> to vector<6x32xf32>
    %27 = vector.extract_strided_slice %26 {offsets = [0, 0], sizes = [1, 32], strides = [1, 1]} : vector<6x32xf32> to vector<1x32xf32>
    %28 = vector.extract_strided_slice %26 {offsets = [1, 0], sizes = [1, 32], strides = [1, 1]} : vector<6x32xf32> to vector<1x32xf32>
    %29 = vector.extract_strided_slice %26 {offsets = [2, 0], sizes = [1, 32], strides = [1, 1]} : vector<6x32xf32> to vector<1x32xf32>
    %30 = vector.extract_strided_slice %26 {offsets = [3, 0], sizes = [1, 32], strides = [1, 1]} : vector<6x32xf32> to vector<1x32xf32>
    %31 = vector.extract_strided_slice %26 {offsets = [4, 0], sizes = [1, 32], strides = [1, 1]} : vector<6x32xf32> to vector<1x32xf32>
    %32 = vector.extract_strided_slice %26 {offsets = [5, 0], sizes = [1, 32], strides = [1, 1]} : vector<6x32xf32> to vector<1x32xf32>
    %33 = arith.truncf %3 : vector<8x32xf32> to vector<8x32xbf16>
    %c0_12 = arith.constant 0 : index
    %c0_13 = arith.constant 0 : index
    %c0_14 = arith.constant 0 : index
    %34 = vector.load %arg4[%c0_12, %c0_13, %c0_14] : memref<1x32x96xbf16, #tpu.memory_space<vmem>>, vector<1x32x96xbf16>
    %35 = vector.shape_cast %34 : vector<1x32x96xbf16> to vector<32x96xbf16>
    %cst_15 = arith.constant dense<0.000000e+00> : vector<8x96xf32>
    %36 = tpu.matmul %33, %35, %cst_15 {dimension_numbers = #tpu.dot_dimension_numbers<[1], [0], [0], [1], [0, 0, 1, 1], [], []>} : vector<8x32xbf16>, vector<32x96xbf16>, vector<8x96xf32> -> vector<8x96xf32>
    %c0_16 = arith.constant 0 : index
    %c0_17 = arith.constant 0 : index
    %c0_18 = arith.constant 0 : index
    %37 = vector.load %arg5[%c0_16, %c0_17, %c0_18] : memref<1x1x96xf32, #tpu.memory_space<vmem>>, vector<1x1x96xf32>
    %38 = vector.shape_cast %37 : vector<1x1x96xf32> to vector<1x96xf32>
    %39 = vector.broadcast %38 : vector<1x96xf32> to vector<8x96xf32>
    %40 = arith.addf %36, %39 : vector<8x96xf32>
    %41 = arith.truncf %40 : vector<8x96xf32> to vector<8x96xbf16>
    %42 = vector.extract_strided_slice %41 {offsets = [0, 0], sizes = [8, 8], strides = [1, 1]} : vector<8x96xbf16> to vector<8x8xbf16>
    %43 = vector.extract_strided_slice %41 {offsets = [0, 32], sizes = [8, 8], strides = [1, 1]} : vector<8x96xbf16> to vector<8x8xbf16>
    %44 = vector.extract_strided_slice %41 {offsets = [0, 64], sizes = [8, 8], strides = [1, 1]} : vector<8x96xbf16> to vector<8x8xbf16>
    %cst_19 = arith.constant dense<0.000000e+00> : vector<8x8xf32>
    %45 = tpu.matmul %42, %43, %cst_19 {dimension_numbers = #tpu.dot_dimension_numbers<[1], [1], [0], [0], [0, 0, 1, 0], [], []>} : vector<8x8xbf16>, vector<8x8xbf16>, vector<8x8xf32> -> vector<8x8xf32>
    %46 = arith.addf %45, %24 : vector<8x8xf32>
    %cst_20 = arith.constant dense<0xFF800000> : vector<8xf32>
    %47 = vector.multi_reduction <maximumf>, %46, %cst_20 [1] : vector<8x8xf32> to vector<8xf32>
    %48 = vector.shape_cast %47 : vector<8xf32> to vector<8x1xf32>
    %49 = vector.broadcast %48 : vector<8x1xf32> to vector<8x8xf32>
    %50 = arith.subf %46, %49 : vector<8x8xf32>
    %51 = math.exp %50 : vector<8x8xf32>
    %cst_21 = arith.constant dense<0.000000e+00> : vector<8xf32>
    %52 = vector.multi_reduction <add>, %51, %cst_21 [1] : vector<8x8xf32> to vector<8xf32>
    %53 = vector.shape_cast %52 : vector<8xf32> to vector<8x1xf32>
    %54 = tpu.reciprocal %53 {approx = true} : vector<8x1xf32> -> vector<8x1xf32>
    %55 = vector.broadcast %54 : vector<8x1xf32> to vector<8x8xf32>
    %56 = arith.mulf %51, %55 : vector<8x8xf32>
    %57 = arith.truncf %56 : vector<8x8xf32> to vector<8x8xbf16>
    %cst_22 = arith.constant dense<0.000000e+00> : vector<8x8xf32>
    %58 = tpu.matmul %57, %44, %cst_22 {dimension_numbers = #tpu.dot_dimension_numbers<[1], [0], [0], [1], [0, 0, 1, 1], [], []>} : vector<8x8xbf16>, vector<8x8xbf16>, vector<8x8xf32> -> vector<8x8xf32>
    %59 = arith.truncf %58 : vector<8x8xf32> to vector<8x8xbf16>
    %c0_23 = arith.constant 0 : index
    %c0_24 = arith.constant 0 : index
    %60 = vector.load %arg13[%c0_23, %c0_24] : memref<8x32xbf16, #tpu.memory_space<vmem>>, vector<8x8xbf16>
    tpu.vector_store %arg13[%c0_23, %c0_24], %59 {strides = array<i32>} : memref<8x32xbf16, #tpu.memory_space<vmem>>, vector<8x8xbf16>,
    %61 = vector.extract_strided_slice %41 {offsets = [0, 8], sizes = [8, 8], strides = [1, 1]} : vector<8x96xbf16> to vector<8x8xbf16>
    %62 = vector.extract_strided_slice %41 {offsets = [0, 40], sizes = [8, 8], strides = [1, 1]} : vector<8x96xbf16> to vector<8x8xbf16>
    %63 = vector.extract_strided_slice %41 {offsets = [0, 72], sizes = [8, 8], strides = [1, 1]} : vector<8x96xbf16> to vector<8x8xbf16>
    %cst_25 = arith.constant dense<0.000000e+00> : vector<8x8xf32>
    %64 = tpu.matmul %61, %62, %cst_25 {dimension_numbers = #tpu.dot_dimension_numbers<[1], [1], [0], [0], [0, 0, 1, 0], [], []>} : vector<8x8xbf16>, vector<8x8xbf16>, vector<8x8xf32> -> vector<8x8xf32>
    %65 = arith.addf %64, %24 : vector<8x8xf32>
    %cst_26 = arith.constant dense<0xFF800000> : vector<8xf32>
    %66 = vector.multi_reduction <maximumf>, %65, %cst_26 [1] : vector<8x8xf32> to vector<8xf32>
    %67 = vector.shape_cast %66 : vector<8xf32> to vector<8x1xf32>
    %68 = vector.broadcast %67 : vector<8x1xf32> to vector<8x8xf32>
    %69 = arith.subf %65, %68 : vector<8x8xf32>
    %70 = math.exp %69 : vector<8x8xf32>
    %cst_27 = arith.constant dense<0.000000e+00> : vector<8xf32>
    %71 = vector.multi_reduction <add>, %70, %cst_27 [1] : vector<8x8xf32> to vector<8xf32>
    %72 = vector.shape_cast %71 : vector<8xf32> to vector<8x1xf32>
    %73 = tpu.reciprocal %72 {approx = true} : vector<8x1xf32> -> vector<8x1xf32>
    %74 = vector.broadcast %73 : vector<8x1xf32> to vector<8x8xf32>
    %75 = arith.mulf %70, %74 : vector<8x8xf32>
    %76 = arith.truncf %75 : vector<8x8xf32> to vector<8x8xbf16>
    %cst_28 = arith.constant dense<0.000000e+00> : vector<8x8xf32>
    %77 = tpu.matmul %76, %63, %cst_28 {dimension_numbers = #tpu.dot_dimension_numbers<[1], [0], [0], [1], [0, 0, 1, 1], [], []>} : vector<8x8xbf16>, vector<8x8xbf16>, vector<8x8xf32> -> vector<8x8xf32>
    %78 = arith.truncf %77 : vector<8x8xf32> to vector<8x8xbf16>
    %c0_29 = arith.constant 0 : index
    %c8 = arith.constant 8 : index
    %79 = vector.load %arg13[%c0_29, %c8] : memref<8x32xbf16, #tpu.memory_space<vmem>>, vector<8x8xbf16>
    tpu.vector_store %arg13[%c0_29, %c8], %78 {strides = array<i32>} : memref<8x32xbf16, #tpu.memory_space<vmem>>, vector<8x8xbf16>,
    %80 = vector.extract_strided_slice %41 {offsets = [0, 16], sizes = [8, 8], strides = [1, 1]} : vector<8x96xbf16> to vector<8x8xbf16>
    %81 = vector.extract_strided_slice %41 {offsets = [0, 48], sizes = [8, 8], strides = [1, 1]} : vector<8x96xbf16> to vector<8x8xbf16>
    %82 = vector.extract_strided_slice %41 {offsets = [0, 80], sizes = [8, 8], strides = [1, 1]} : vector<8x96xbf16> to vector<8x8xbf16>
    %cst_30 = arith.constant dense<0.000000e+00> : vector<8x8xf32>
    %83 = tpu.matmul %80, %81, %cst_30 {dimension_numbers = #tpu.dot_dimension_numbers<[1], [1], [0], [0], [0, 0, 1, 0], [], []>} : vector<8x8xbf16>, vector<8x8xbf16>, vector<8x8xf32> -> vector<8x8xf32>
    %84 = arith.addf %83, %24 : vector<8x8xf32>
    %cst_31 = arith.constant dense<0xFF800000> : vector<8xf32>
    %85 = vector.multi_reduction <maximumf>, %84, %cst_31 [1] : vector<8x8xf32> to vector<8xf32>
    %86 = vector.shape_cast %85 : vector<8xf32> to vector<8x1xf32>
    %87 = vector.broadcast %86 : vector<8x1xf32> to vector<8x8xf32>
    %88 = arith.subf %84, %87 : vector<8x8xf32>
    %89 = math.exp %88 : vector<8x8xf32>
    %cst_32 = arith.constant dense<0.000000e+00> : vector<8xf32>
    %90 = vector.multi_reduction <add>, %89, %cst_32 [1] : vector<8x8xf32> to vector<8xf32>
    %91 = vector.shape_cast %90 : vector<8xf32> to vector<8x1xf32>
    %92 = tpu.reciprocal %91 {approx = true} : vector<8x1xf32> -> vector<8x1xf32>
    %93 = vector.broadcast %92 : vector<8x1xf32> to vector<8x8xf32>
    %94 = arith.mulf %89, %93 : vector<8x8xf32>
    %95 = arith.truncf %94 : vector<8x8xf32> to vector<8x8xbf16>
    %cst_33 = arith.constant dense<0.000000e+00> : vector<8x8xf32>
    %96 = tpu.matmul %95, %82, %cst_33 {dimension_numbers = #tpu.dot_dimension_numbers<[1], [0], [0], [1], [0, 0, 1, 1], [], []>} : vector<8x8xbf16>, vector<8x8xbf16>, vector<8x8xf32> -> vector<8x8xf32>
    %97 = arith.truncf %96 : vector<8x8xf32> to vector<8x8xbf16>
    %c0_34 = arith.constant 0 : index
    %c16 = arith.constant 16 : index
    %98 = vector.load %arg13[%c0_34, %c16] : memref<8x32xbf16, #tpu.memory_space<vmem>>, vector<8x8xbf16>
    tpu.vector_store %arg13[%c0_34, %c16], %97 {strides = array<i32>} : memref<8x32xbf16, #tpu.memory_space<vmem>>, vector<8x8xbf16>,
    %99 = vector.extract_strided_slice %41 {offsets = [0, 24], sizes = [8, 8], strides = [1, 1]} : vector<8x96xbf16> to vector<8x8xbf16>
    %100 = vector.extract_strided_slice %41 {offsets = [0, 56], sizes = [8, 8], strides = [1, 1]} : vector<8x96xbf16> to vector<8x8xbf16>
    %101 = vector.extract_strided_slice %41 {offsets = [0, 88], sizes = [8, 8], strides = [1, 1]} : vector<8x96xbf16> to vector<8x8xbf16>
    %cst_35 = arith.constant dense<0.000000e+00> : vector<8x8xf32>
    %102 = tpu.matmul %99, %100, %cst_35 {dimension_numbers = #tpu.dot_dimension_numbers<[1], [1], [0], [0], [0, 0, 1, 0], [], []>} : vector<8x8xbf16>, vector<8x8xbf16>, vector<8x8xf32> -> vector<8x8xf32>
    %103 = arith.addf %102, %24 : vector<8x8xf32>
    %cst_36 = arith.constant dense<0xFF800000> : vector<8xf32>
    %104 = vector.multi_reduction <maximumf>, %103, %cst_36 [1] : vector<8x8xf32> to vector<8xf32>
    %105 = vector.shape_cast %104 : vector<8xf32> to vector<8x1xf32>
    %106 = vector.broadcast %105 : vector<8x1xf32> to vector<8x8xf32>
    %107 = arith.subf %103, %106 : vector<8x8xf32>
    %108 = math.exp %107 : vector<8x8xf32>
    %cst_37 = arith.constant dense<0.000000e+00> : vector<8xf32>
    %109 = vector.multi_reduction <add>, %108, %cst_37 [1] : vector<8x8xf32> to vector<8xf32>
    %110 = vector.shape_cast %109 : vector<8xf32> to vector<8x1xf32>
    %111 = tpu.reciprocal %110 {approx = true} : vector<8x1xf32> -> vector<8x1xf32>
    %112 = vector.broadcast %111 : vector<8x1xf32> to vector<8x8xf32>
    %113 = arith.mulf %108, %112 : vector<8x8xf32>
    %114 = arith.truncf %113 : vector<8x8xf32> to vector<8x8xbf16>
    %cst_38 = arith.constant dense<0.000000e+00> : vector<8x8xf32>
    %115 = tpu.matmul %114, %101, %cst_38 {dimension_numbers = #tpu.dot_dimension_numbers<[1], [0], [0], [1], [0, 0, 1, 1], [], []>} : vector<8x8xbf16>, vector<8x8xbf16>, vector<8x8xf32> -> vector<8x8xf32>
    %116 = arith.truncf %115 : vector<8x8xf32> to vector<8x8xbf16>
    %c0_39 = arith.constant 0 : index
    %c24 = arith.constant 24 : index
    %117 = vector.load %arg13[%c0_39, %c24] : memref<8x32xbf16, #tpu.memory_space<vmem>>, vector<8x8xbf16>
    tpu.vector_store %arg13[%c0_39, %c24], %116 {strides = array<i32>} : memref<8x32xbf16, #tpu.memory_space<vmem>>, vector<8x8xbf16>,
    %c0_40 = arith.constant 0 : index
    %c0_41 = arith.constant 0 : index
    %118 = vector.load %arg13[%c0_40, %c0_41] : memref<8x32xbf16, #tpu.memory_space<vmem>>, vector<8x32xbf16>
    %c0_42 = arith.constant 0 : index
    %c0_43 = arith.constant 0 : index
    %c0_44 = arith.constant 0 : index
    %119 = vector.load %arg6[%c0_42, %c0_43, %c0_44] : memref<1x32x32xbf16, #tpu.memory_space<vmem>>, vector<1x32x32xbf16>
    %120 = vector.shape_cast %119 : vector<1x32x32xbf16> to vector<32x32xbf16>
    %cst_45 = arith.constant dense<0.000000e+00> : vector<8x32xf32>
    %121 = tpu.matmul %118, %120, %cst_45 {dimension_numbers = #tpu.dot_dimension_numbers<[1], [0], [0], [1], [0, 0, 1, 1], [], []>} : vector<8x32xbf16>, vector<32x32xbf16>, vector<8x32xf32> -> vector<8x32xf32>
    %122 = vector.broadcast %27 : vector<1x32xf32> to vector<8x32xf32>
    %123 = arith.addf %121, %122 : vector<8x32xf32>
    %124 = arith.addf %123, %3 : vector<8x32xf32>
    %cst_46 = arith.constant dense<0.000000e+00> : vector<8xf32>
    %125 = vector.multi_reduction <add>, %124, %cst_46 [1] : vector<8x32xf32> to vector<8xf32>
    %126 = vector.shape_cast %125 : vector<8xf32> to vector<8x1xf32>
    %cst_47 = arith.constant 3.200000e+01 : f32
    %127 = vector.broadcast %cst_47 : f32 to vector<8x1xf32>
    %128 = arith.divf %126, %127 : vector<8x1xf32>
    %129 = vector.broadcast %128 : vector<8x1xf32> to vector<8x32xf32>
    %130 = arith.subf %124, %129 : vector<8x32xf32>
    %131 = arith.mulf %130, %130 : vector<8x32xf32>
    %cst_48 = arith.constant dense<0.000000e+00> : vector<8xf32>
    %132 = vector.multi_reduction <add>, %131, %cst_48 [1] : vector<8x32xf32> to vector<8xf32>
    %133 = vector.shape_cast %132 : vector<8xf32> to vector<8x1xf32>
    %cst_49 = arith.constant 3.200000e+01 : f32
    %134 = vector.broadcast %cst_49 : f32 to vector<8x1xf32>
    %135 = arith.divf %133, %134 : vector<8x1xf32>
    %136 = vector.broadcast %128 : vector<8x1xf32> to vector<8x32xf32>
    %137 = arith.subf %124, %136 : vector<8x32xf32>
    %cst_50 = arith.constant 9.99999974E-6 : f32
    %138 = vector.broadcast %cst_50 : f32 to vector<8x1xf32>
    %139 = arith.addf %135, %138 : vector<8x1xf32>
    %140 = math.rsqrt %139 : vector<8x1xf32>
    %141 = vector.broadcast %140 : vector<8x1xf32> to vector<8x32xf32>
    %142 = arith.mulf %137, %141 : vector<8x32xf32>
    %143 = vector.broadcast %28 : vector<1x32xf32> to vector<8x32xf32>
    %144 = arith.mulf %142, %143 : vector<8x32xf32>
    %145 = vector.broadcast %29 : vector<1x32xf32> to vector<8x32xf32>
    %146 = arith.addf %144, %145 : vector<8x32xf32>
    %147 = arith.truncf %146 : vector<8x32xf32> to vector<8x32xbf16>
    %c0_51 = arith.constant 0 : index
    %c0_52 = arith.constant 0 : index
    %c0_53 = arith.constant 0 : index
    %148 = vector.load %arg7[%c0_51, %c0_52, %c0_53] : memref<1x32x64xbf16, #tpu.memory_space<vmem>>, vector<1x32x64xbf16>
    %149 = vector.shape_cast %148 : vector<1x32x64xbf16> to vector<32x64xbf16>
    %cst_54 = arith.constant dense<0.000000e+00> : vector<8x64xf32>
    %150 = tpu.matmul %147, %149, %cst_54 {dimension_numbers = #tpu.dot_dimension_numbers<[1], [0], [0], [1], [0, 0, 1, 1], [], []>} : vector<8x32xbf16>, vector<32x64xbf16>, vector<8x64xf32> -> vector<8x64xf32>
    %c0_55 = arith.constant 0 : index
    %c0_56 = arith.constant 0 : index
    %c0_57 = arith.constant 0 : index
    %151 = vector.load %arg8[%c0_55, %c0_56, %c0_57] : memref<1x1x64xf32, #tpu.memory_space<vmem>>, vector<1x1x64xf32>
    %152 = vector.shape_cast %151 : vector<1x1x64xf32> to vector<1x64xf32>
    %153 = vector.broadcast %152 : vector<1x64xf32> to vector<8x64xf32>
    %154 = arith.addf %150, %153 : vector<8x64xf32>
    %cst_58 = arith.constant 5.000000e-01 : f32
    %155 = vector.broadcast %cst_58 : f32 to vector<8x64xf32>
    %156 = arith.mulf %155, %154 : vector<8x64xf32>
    %cst_59 = arith.constant 0.707106769 : f32
    %157 = vector.broadcast %cst_59 : f32 to vector<8x64xf32>
    %158 = arith.mulf %154, %157 : vector<8x64xf32>
    %159 = math.erf %158 : vector<8x64xf32>
    %cst_60 = arith.constant 1.000000e+00 : f32
    %160 = vector.broadcast %cst_60 : f32 to vector<8x64xf32>
    %161 = arith.addf %160, %159 : vector<8x64xf32>
    %162 = arith.mulf %156, %161 : vector<8x64xf32>
    %163 = arith.truncf %162 : vector<8x64xf32> to vector<8x64xbf16>
    %c0_61 = arith.constant 0 : index
    %c0_62 = arith.constant 0 : index
    %c0_63 = arith.constant 0 : index
    %164 = vector.load %arg9[%c0_61, %c0_62, %c0_63] : memref<1x64x32xbf16, #tpu.memory_space<vmem>>, vector<1x64x32xbf16>
    %165 = vector.shape_cast %164 : vector<1x64x32xbf16> to vector<64x32xbf16>
    %cst_64 = arith.constant dense<0.000000e+00> : vector<8x32xf32>
    %166 = tpu.matmul %163, %165, %cst_64 {dimension_numbers = #tpu.dot_dimension_numbers<[1], [0], [0], [1], [0, 0, 1, 1], [], []>} : vector<8x64xbf16>, vector<64x32xbf16>, vector<8x32xf32> -> vector<8x32xf32>
    %167 = vector.broadcast %30 : vector<1x32xf32> to vector<8x32xf32>
    %168 = arith.addf %166, %167 : vector<8x32xf32>
    %169 = arith.addf %168, %146 : vector<8x32xf32>
    %cst_65 = arith.constant dense<0.000000e+00> : vector<8xf32>
    %170 = vector.multi_reduction <add>, %169, %cst_65 [1] : vector<8x32xf32> to vector<8xf32>
    %171 = vector.shape_cast %170 : vector<8xf32> to vector<8x1xf32>
    %cst_66 = arith.constant 3.200000e+01 : f32
    %172 = vector.broadcast %cst_66 : f32 to vector<8x1xf32>
    %173 = arith.divf %171, %172 : vector<8x1xf32>
    %174 = vector.broadcast %173 : vector<8x1xf32> to vector<8x32xf32>
    %175 = arith.subf %169, %174 : vector<8x32xf32>
    %176 = arith.mulf %175, %175 : vector<8x32xf32>
    %cst_67 = arith.constant dense<0.000000e+00> : vector<8xf32>
    %177 = vector.multi_reduction <add>, %176, %cst_67 [1] : vector<8x32xf32> to vector<8xf32>
    %178 = vector.shape_cast %177 : vector<8xf32> to vector<8x1xf32>
    %cst_68 = arith.constant 3.200000e+01 : f32
    %179 = vector.broadcast %cst_68 : f32 to vector<8x1xf32>
    %180 = arith.divf %178, %179 : vector<8x1xf32>
    %181 = vector.broadcast %173 : vector<8x1xf32> to vector<8x32xf32>
    %182 = arith.subf %169, %181 : vector<8x32xf32>
    %cst_69 = arith.constant 9.99999974E-6 : f32
    %183 = vector.broadcast %cst_69 : f32 to vector<8x1xf32>
    %184 = arith.addf %180, %183 : vector<8x1xf32>
    %185 = math.rsqrt %184 : vector<8x1xf32>
    %186 = vector.broadcast %185 : vector<8x1xf32> to vector<8x32xf32>
    %187 = arith.mulf %182, %186 : vector<8x32xf32>
    %188 = vector.broadcast %31 : vector<1x32xf32> to vector<8x32xf32>
    %189 = arith.mulf %187, %188 : vector<8x32xf32>
    %190 = vector.broadcast %32 : vector<1x32xf32> to vector<8x32xf32>
    %191 = arith.addf %189, %190 : vector<8x32xf32>
    %c0_70 = arith.constant 0 : index
    %c0_71 = arith.constant 0 : index
    %192 = vector.load %arg12[%c0_70, %c0_71] : memref<8x32xf32, #tpu.memory_space<vmem>>, vector<8x32xf32>
    tpu.vector_store %arg12[%c0_70, %c0_71], %191 {strides = array<i32>} : memref<8x32xf32, #tpu.memory_space<vmem>>, vector<8x32xf32>,
    %c1_i32_72 = arith.constant 1 : i32
    %193 = arith.cmpi eq, %arg1, %c1_i32_72 : i32
    %194 = arith.extui %193 : i1 to i32
    %c0_i32_73 = arith.constant 0 : i32
    %195 = arith.cmpi ne, %194, %c0_i32_73 : i32
    scf.if %195 {
      %c0_74 = arith.constant 0 : index
      %c0_75 = arith.constant 0 : index
      %c0_76 = arith.constant 0 : index
      %196 = vector.load %arg11[%c0_74, %c0_75, %c0_76] : memref<1x8x32xf32, #tpu.memory_space<vmem>>, vector<1x8x32xf32>
      %197 = vector.shape_cast %196 : vector<1x8x32xf32> to vector<8x32xf32>
      %198 = vector.shape_cast %191 : vector<8x32xf32> to vector<1x8x32xf32>
      tpu.vector_store %arg11[%c0_74, %c0_75, %c0_76], %198 {strides = array<i32>} : memref<1x8x32xf32, #tpu.memory_space<vmem>>, vector<1x8x32xf32>,
    } else {
    }
    return
  }
  func.func @transform_0(%arg0: i32, %arg1: i32) -> (i32, i32, i32) {
    %c0_i32 = arith.constant 0 : i32
    %c0_i32_0 = arith.constant 0 : i32
    %c0_i32_1 = arith.constant 0 : i32
    return %arg0, %c0_i32, %c0_i32_0 : i32, i32, i32
  }
  func.func @transform_1(%arg0: i32, %arg1: i32) -> (i32, i32, i32) {
    %c0_i32 = arith.constant 0 : i32
    %c0_i32_0 = arith.constant 0 : i32
    %c0_i32_1 = arith.constant 0 : i32
    return %arg0, %c0_i32, %c0_i32_0 : i32, i32, i32
  }
  func.func @transform_2(%arg0: i32, %arg1: i32) -> (i32, i32, i32) {
    %c0_i32 = arith.constant 0 : i32
    %c0_i32_0 = arith.constant 0 : i32
    %c0_i32_1 = arith.constant 0 : i32
    return %arg1, %c0_i32, %c0_i32_0 : i32, i32, i32
  }
  func.func @transform_3(%arg0: i32, %arg1: i32) -> (i32, i32, i32) {
    %c0_i32 = arith.constant 0 : i32
    %c0_i32_0 = arith.constant 0 : i32
    %c0_i32_1 = arith.constant 0 : i32
    return %arg1, %c0_i32, %c0_i32_0 : i32, i32, i32
  }
  func.func @transform_4(%arg0: i32, %arg1: i32) -> (i32, i32, i32) {
    %c0_i32 = arith.constant 0 : i32
    %c0_i32_0 = arith.constant 0 : i32
    %c0_i32_1 = arith.constant 0 : i32
    return %arg1, %c0_i32, %c0_i32_0 : i32, i32, i32
  }
  func.func @transform_5(%arg0: i32, %arg1: i32) -> (i32, i32, i32) {
    %c0_i32 = arith.constant 0 : i32
    %c0_i32_0 = arith.constant 0 : i32
    %c0_i32_1 = arith.constant 0 : i32
    return %arg1, %c0_i32, %c0_i32_0 : i32, i32, i32
  }
  func.func @transform_6(%arg0: i32, %arg1: i32) -> (i32, i32, i32) {
    %c0_i32 = arith.constant 0 : i32
    %c0_i32_0 = arith.constant 0 : i32
    %c0_i32_1 = arith.constant 0 : i32
    return %arg1, %c0_i32, %c0_i32_0 : i32, i32, i32
  }
  func.func @transform_7(%arg0: i32, %arg1: i32) -> (i32, i32, i32) {
    %c0_i32 = arith.constant 0 : i32
    %c0_i32_0 = arith.constant 0 : i32
    %c0_i32_1 = arith.constant 0 : i32
    return %arg1, %c0_i32, %c0_i32_0 : i32, i32, i32
  }
  func.func @transform_8(%arg0: i32, %arg1: i32) -> (i32, i32, i32) {
    %c0_i32 = arith.constant 0 : i32
    %c0_i32_0 = arith.constant 0 : i32
    %c0_i32_1 = arith.constant 0 : i32
    return %arg1, %c0_i32, %c0_i32_0 : i32, i32, i32
  }
  func.func @transform_9(%arg0: i32, %arg1: i32) -> (i32, i32, i32) {
    %c0_i32 = arith.constant 0 : i32
    %c0_i32_0 = arith.constant 0 : i32
    %c0_i32_1 = arith.constant 0 : i32
    return %arg0, %c0_i32, %c0_i32_0 : i32, i32, i32
  }
}

</mosaic_0001>

<bundles_post_ra>
// kernel: tpu_custom_call.1
= control target key start
LH: loop header
LB: loop body
LE: loop exit
PB: predicated region body
PF: predicated region fallthrough
CT: control target
= control target key end

     0   :  { %s2362_s0 = inlined_call_operand.hbm [shape: f32[2,8,32], index: 0, kind: input, shape index: {}]   ;;  %s2363_s1 = inlined_call_operand.vmem [shape: f32[2,1,8], index: 1, kind: input, shape index: {}]   ;;  %s2364_s2 = inlined_call_operand.vmem [shape: bf16[2,32,96], index: 2, kind: input, shape index: {}]   ;;  %s2365_s3 = inlined_call_operand.vmem [shape: f32[2,1,96], index: 3, kind: input, shape index: {}]   ;;  %s2366_s4 = inlined_call_operand.vmem [shape: bf16[2,32,32], index: 4, kind: input, shape index: {}]   ;;  %s2367_s5 = inlined_call_operand.vmem [shape: bf16[2,32,64], index: 5, kind: input, shape index: {}]   ;;  %s2368_s6 = inlined_call_operand.vmem [shape: f32[2,1,64], index: 6, kind: input, shape index: {}]   ;;  %s2369_s7 = inlined_call_operand.vmem [shape: bf16[2,64,32], index: 7, kind: input, shape index: {}]   ;;  %s2370_s8 = inlined_call_operand.vmem [shape: f32[2,6,32], index: 8, kind: input, shape index: {}]   ;;  %s2371_s9 = inlined_call_operand.hbm [shape: f32[2,8,32], index: 9, kind: output, shape index: {}]  }
   0x1   :  { %2385 = sst [smem:[#allocation22_spill]] %s2362_s0 }
   0x2   :  { %2386 = sst [smem:[#allocation23_spill]] %s2364_s2 }
   0x3   :  { %2387 = sst [smem:[#allocation24_spill]] %s2371_s9 }
   0x4   :  { %14 = vsyncpa [#allocation5], 0 }
   0x5   :  { %16 = vsyncpa [#allocation5 + $0x1], 0 }
   0x6   :  { %17 = vsyncpa [#allocation6], 0 }
   0x7   :  { %19 = vsyncpa [#allocation6 + $0x1], 0  ;;  %s2018_s30 = smov 0   ;;  %s2020_s10 = smov 0  }
   0x8   :  { %s2022_s11 = smov 0   ;;  %s2024_s12 = smov 0  }
   0x9   :  { %s2026_s13 = smov 0   ;;  %s2028_s14 = smov 0  }
   0xa   :  { %s2030_s15 = smov 0   ;;  %s2032_s16 = smov 0  }
   0xb LB: > { %2388 = sst [smem:[#allocation10_spill]] %s1919_s30  ;;  %s1524_s17 = sadd.s32 4294967295, %s1947_s16   ;;  %s1947_s16 = sphi %s2032_s16, %s25_s16   ;;  %s1943_s15 = sphi %s2030_s15, %s2422_s15   ;;  %s1939_s14 = sphi %s2028_s14, %s2421_s14   ;;  %s1935_s13 = sphi %s2026_s13, %s2420_s13   ;;  %s1931_s12 = sphi %s2024_s12, %s2419_s12   ;;  %s1927_s11 = sphi %s2022_s11, %s2418_s11   ;;  %s1923_s10 = sphi %s2020_s10, %s2417_s10   ;;  %s1919_s30 = sphi %s2018_s30, %s2416_s30  }
   0xc   : > { %2389 = sst [smem:[#allocation11_spill]] %s1923_s10  ;;  %s1525_s18 = sadd.s32 4294967294, %s1947_s16  }
   0xd   : > { %2390 = sst [smem:[#allocation12_spill]] %s1927_s11  ;;  %s34_s19 = sadd.s32 1, %s1939_s14 }
   0xe   : > { %2391 = sst [smem:[#allocation13_spill]] %s1939_s14  ;;  %s37_s20 = sadd.s32 1, %s1943_s15 }
   0xf   : > { %2392 = sst [smem:[#allocation14_spill]] %s1943_s15  ;;  %p35_p0 = scmp.ge.s32.totalorder %s34_s19, 2 }
  0x10   : > { %2393 = sst [smem:[#allocation15_spill]] %s1947_s16  ;;  %s44_s21 = sadd.s32 1, %s1927_s11 }
  0x11   : > { %p51_p1 = scmp.ne.s32.totalorder %s1927_s11, %s1923_s10  ;;  %p52_p2 = scmp.eq.s32.totalorder %s1947_s16, 0 }
  0x12   : > { %s2424_s19 = smov (%p35_p0, %s34_s19), 0  ;;  %s2426_s20 = smov (!%p35_p0, %s37_s20), %s1943_s15 }
  0x13   : > { %2394 = sst [smem:[#allocation16_spill]] %s2424_s19  ;;  %p2069_p3 = por %p52_p2, %p51_p1 }
  0x14   : > { %p57_p4 = scmp.ne.s32.totalorder %s1923_s10, %s1919_s30  ;;  %p39_p5 = scmp.ge.s32.totalorder %s2426_s20, 2 }
  0x15   : > { %p58_p6 = scmp.eq.s32.totalorder %s1524_s17, 0  ;;  %p289_p7 = scmp.eq.s32.totalorder %s1524_s17, 3 }
  0x16   : > { %p295_p8 = scmp.eq.s32.totalorder %s1525_s18, 3  ;;  %s2428_s20 = smov (%p39_p5, %s2426_s20), 0 }
  0x17   : > { %2396 = sst [smem:[#allocation17_spill]] %s2428_s20  ;;  %p2077_p9 = por %p58_p6, %p57_p4 }
  0x18   : > { %p2081_p10 = por %p289_p7, %p51_p1  ;;  %s41_s25 = ssub.s32 %s1943_s15, %s2428_s20 }
  0x19   : > { %p2087_p11 = por %p295_p8, %p57_p4  ;;  %p42_p12 = scmp.eq.s32.totalorder %s41_s25, 0 }
  0x1a   : > { %s2398_s24 = scalar_select %p2081_p10, 1, 0 }
  0x1b   : > { %s2400_s26 = scalar_select %p2087_p11, 1, 0 }
  0x1c   : > { %2399 = sst [smem:[#allocation18_spill]] %s2398_s24  ;;  %p1708_p13 = scmp.lt.s32.totalorder %s1947_s16, 4 }
  0x1d   : > { %2401 = sst [smem:[#allocation19_spill]] %s2400_s26  ;;  %s315_s27 = sand.u32 1, %s1927_s11  }
  0x1e   : > { %s2094_s28 = scalar_select %p42_p12, %s1927_s11, %s44_s21  }
  0x1f   : > { %s1528_s29 = sshll.u32 %s315_s27, 3  ;;  %s1529_s17 = sshll.u32 %s1943_s15, 7 }
  0x20   : > { %2402 = sst [smem:[#allocation20_spill]] %s2094_s28  ;;  %s319_s30 = scalar_lea.vmem [#allocation4], %s1528_s29 }
  0x21   : > { %s2403_s0 = sld [smem:[#allocation22_spill]]  ;;  %s326_s9 = sshll.u32 %s319_s30, 4  ;;  %s327_s9 = int_to_ptr.vmem [resolvable:$true] %s326_s9 }
  0x22   : > { %p2102_p0 = pnand %p1708_p13, %p2069_p3  ;;  %p1530_p1 = scmp.ge.s32.totalorder %s1947_s16, 1 }
  0x23   : > { %p388_p2 = scmp.lt.s32.totalorder %s1947_s16, 5  ;;  %s316_s25 = scalar_lea.sflag [#allocation5], %s315_s27 }
  0x24   : > { %p1825_p4 = pneg %p2102_p0  ;;  %s1836_s21 = scalar_lea.vmem %s327_s9, 128 }
  0x25   : > { %p1837_p5 = scmp.ne.s32.totalorder %s327_s9, %s1836_s21  ;;  %s1949_s19 = smov [#allocation4]  }
  0x27   : > { %s324_s14 = scalar_lea.hbm %s2403_s0, %s1529_s17  ;;  %p1839_p6 = pnand %p1837_p5, %p1825_p4 }
  0x28   : > { %s1841_s17 = sshll.u32 %s1949_s19, 4  ;;  %s1842_s17 = int_to_ptr.vmem [resolvable:$false] %s1841_s17 }
  0x29   : > { %p1840_p7 = pneg %p1839_p6  ;;  %s1843_s30 = scalar_lea.vmem %s1842_s17, 256 }
  0x2a   : > { %p1844_p8 = scmp.lt.s32.totalorder %s327_s9, %s1842_s17  ;;  %p1845_p12 = scmp.lt.s32.totalorder %s1843_s30, %s1836_s21 }
  0x2c   : > { %p1846_p3 = por %p1845_p12, %p1844_p8 }
  0x2e   : > { %p1847_p13 = pnand %p1846_p3, %p1840_p7 }
  0x30   : > { %1850 = shalt.err (!%p1847_p13)
}
  0x31   : > { %1703 = dma.hbm_to_vmem [thread:$0]  (!%p2102_p0), %s324_s14, 128, %s327_s9, %s316_s25  }
  0x32   : > { %p389_p11 = pnand %p1530_p1, %p388_p2 }
  0x34   : > { %392 = sbr.rel (%p389_p11) target bundleno = 2550 (0x9f6), region = 56 }
  0x39   : > { %s2117_s22 = sand.u32 1, %s1923_s10  }
  0x3a   : > { %2405 = sst [smem:[#allocation21_spill]] %s2117_s22  ;;  %s1531_s27 = sshll.u32 %s2117_s22, 3 }
  0x3b   : > { %s395_s29 = scalar_lea.sflag [#allocation5], %s2117_s22  ;;  %s398_s18 = scalar_lea.vmem [#allocation4], %s1531_s27 }
  0x3c   : > { %1910 = dma.done.wait (%p2077_p9), %s395_s29, 128  }
  0x3d   : > { %1912 = vsyncadd (%p2077_p9), %s395_s29, 4294967168  ;;  %p466_p0 = scmp.lt.s32.totalorder %s1935_s13, 1  ;;  %p469_p11 = scmp.lt.s32.totalorder %s1931_s12, 1 }
  0x3e   : > { %s2406_s2 = sld [smem:[#allocation23_spill]]  ;;  %p1542_p9 = scmp.ne.s32.totalorder %s1931_s12, 0 }
  0x3f   : > { %s2128_s9 = scalar_select %p466_p0, %s1935_s13, 1 }
  0x40   : > { %s2131_s14 = scalar_select %p469_p11, %s1931_s12, 1 }
  0x42   : > { %s1575_s21 = sshll.u32 %s2131_s14, 4  ;;  %s489_s24 = scalar_lea.vmem %s2368_s6, %s2131_s14 }
  0x43   : > { %s2148_s10 = scalar_lea.vmem %s2366_s4, %s1575_s21  ;;  %s2153_s26 = scalar_lea.vmem %s2367_s5, %s1575_s21 }
  0x44   : > { %s473_s15 = scalar_lea.vmem %s2406_s2, %s1575_s21  ;;  %s1578_s19 = sshll.u32 %s2131_s14, 5 }
  0x45   : > { %s1541_s17 = sshll.u32 %s2131_s14, 3  ;;  %s2164_s0 = scalar_lea.vmem %s2369_s7, %s1578_s19 }
  0x46   : > { %s2169_s28 = scalar_lea.vmem %s2370_s8, %s1541_s17  ;;  %s2171_s2 = scalar_lea.vmem [#allocation7], %s1531_s27 }
  0x47   : > { %503 = sbr.rel (%p1542_p9) target bundleno = 78 (0x4e), region = 64 }
  0x4c   : > { %v504_v0 = vld [vmem:[%s398_s18] sm:$0xff]  ;;  %vm505_vm0 = vcmask 261120  }
  0x4d   : > { %506 = vst.msk [vmem:[#allocation2] sm:$0xff] %vm505_vm0, %v504_v0 }
  0x4e PF: > { %v1791_v1 = vld [vmem:[%s473_s15 + $0x8] sm:$0xff]   ;;  %v1950_v2 = vmov 0.0   ;;  %v1792_v3 = vld [vmem:[%s473_s15] sm:$0xff]   ;;  %vm1951_vm1 = vmmov 0   ;;  %vm554_vm2 = vcmask 261120   ;;  %s2407_s22 = scalar_lea.vmem %s2365_s3, %s2131_s14  ;;  %s1952_s27 = smov 120   ;;  %v512_v24 = vlaneseq }
  0x4f   : > { %1612 = vmatprep.subr.bf16.mxu0 %v1950_v2  ;;  %1620 = vmatprep.subr.bf16.mxu1 %v1950_v2  ;;  %v1543_v6 = vld [vmem:[%s2407_s22] ss:$0 sm:$0xff]  ;;  %s1953_s18 = smov 96   ;;  %s1954_s23 = smov 80   ;;  %vm602_vm3 = vcmask 64512   ;;  %vm666_vm6 = vcmask 1043456  }
  0x50   : > { %1613 = vmatpush3.bf16.msra.mxu0 %v1791_v1  ;;  %1616 = vmatprep.mubr.msk.bf16.mxu0 %vm1951_vm1, %v1950_v2  ;;  %s1955_s21 = smov 88   ;;  %s1956_s30 = smov 72   ;;  %v2225_v25 = vshrl.u32 %v512_v24, 7  ;;  %v520_v26 = vand.u32 127, %v512_v24  ;;  %v1959_v29 = vmov -1e+09  }
  0x51   : > { %1614 = vmatprep.subr.bf16.mxu0 %v1950_v2  ;;  %1622 = vmatprep.mubr.msk.bf16.mxu1 %vm1951_vm1, %v1950_v2  ;;  %s1957_s20 = smov 112   ;;  %s1958_s25 = smov 104   ;;  %vm711_vm7 = vcmask 60416   ;;  %vm830_vm8 = vcmask 126016   ;;  %vm949_vm9 = vcmask 191616   ;;  %vm1068_vm10 = vcmask 257216  }
  0x52   : > { %p523_p1 = scmp.ge.s32.totalorder %s1931_s12, 1  ;;  %s2408_s11 = scalar_lea.vmem %s2363_s1, %s2128_s9  ;;  %vm521_vm5 = vcmp.le.s32.totalorder %v520_v26, %v2225_v25  ;;  %v514_v28 = vsub.s32 0, %v2225_v25  ;;  %vm1268_vm11 = vcmask 523264  }
  0x53   : > { %v508_v27 = vld [vmem:[%s2408_s11] sm:$0x1]  ;;  %v522_v31 = vsel %vm521_vm5, 0.0, %v1959_v29  ;;  %s1960_s9 = smov 56   ;;  %s1961_s16 = smov 64  }
  0x54   : > { %v2178_v4 = vld [vmem:[#allocation2] sm:$0xff]  ;;  %1615 = vmatpush3.bf16.msra.mxu0 %v1792_v3  ;;  %s524_s19 = scalar_select %p523_p1, 1, 0  ;;  %vm509_vm4 = vcmp.gt.f32.partialorder %v508_v27, 0.5 }
  0x55   : > { %v530_v5 = vpack.c.bf16 %v2178_v4, %v2178_v4  ;;  %1626 = vmatprep.subr.bf16.mxu0 %v1950_v2  ;;  %v510_v30 = vsel %vm509_vm4, 0.0, %v1959_v29  ;;  %s1962_s22 = smov 40   ;;  %p1570_p2 = scmp.ne.s32.totalorder %s1931_s12, 1 }
  0x56   : > { %s525_s15 = scvt.s32.f32 %s524_s19  ;;  %v515_v33 = vrot.slane %v510_v30, %v514_v28 }
  0x57   : > { %1617 = vmatmul.mubr.msk.bf16.vlgmr.msra.gmra.mxu0 %vm554_vm2, %v530_v5 }
  0x58   : > { %1628 = vmatprep.mubr.msk.bf16.mxu0 %vm1951_vm1, %v1950_v2  ;;  %v526_v32 = vstv %s525_s15 }
  0x59   : > { %v527_v34 = vmul.f32 %v526_v32, %v522_v31 }
  0x5b   : > { %v528_v35 = vadd.f32 %v527_v34, %v515_v33 }
 0x117   : > { %v592_v7 = vpop.f32.mrf.mxu0 }
 0x118   : > { %v593_v8 = vadd.f32 %v1543_v6, %v592_v7 }
 0x119   : > { %v1618_v9 = vpop.f32.mrf.mxu0 }
 0x11a   : > { %v2194_v10 = vpack.c.bf16 %v593_v8, %v593_v8 }
 0x11b   : > { %v595_v11 = vpop.f32.mrf.mxu0 }
 0x11c   : > { %713 = vrot.lane.b32.xlu1 %v2194_v10, %s1952_s27  ;;  %600 = vrot.lane.b32.xlu0 %v2194_v10, %s1953_s18  ;;  %s1963_s27 = smov 48   ;;  %s1964_s18 = smov 8  }
 0x11d   : > { %v1619_v12 = vpop.f32.mrf.mxu0 }
 0x120   : > { %834 = vrot.lane.b32.xlu1 %v2194_v10, %s1954_s23  ;;  %715 = vrot.lane.b32.xlu0 %v2194_v10, %s1955_s21  ;;  %s1965_s23 = smov 16   ;;  %s1966_s21 = smov 24  }
 0x124   : > { %953 = vrot.lane.b32.xlu1 %v2194_v10, %s1956_s30  ;;  %832 = vrot.lane.b32.xlu0 %v2194_v10, %s1957_s20 }
 0x128   : > { %951 = vrot.lane.b32.xlu0 %v2194_v10, %s1958_s25 }
 0x18e   : > { %v601_v13 = vpop.permute.xlu0 %600  ;;  %v714_v16 = vpop.permute.xlu1 %713 }
 0x18f   : > { %v607_v14 = vsel %vm602_vm3, %v601_v13, 0 }
 0x190   : > { %1621 = vmatpush3.bf16.xpose.msra.mxu1 %v607_v14 }
 0x191   : > { %1632 = vmatprep.subr.bf16.mxu1 %v1950_v2 }
 0x192   : > { %v716_v15 = vpop.permute.xlu0 %715  ;;  %v835_v18 = vpop.permute.xlu1 %834 }
 0x193   : > { %v721_v17 = vsel %vm602_vm3, %v716_v15, 0  ;;  %v840_v19 = vsel %vm602_vm3, %v835_v18, 0 }
 0x196   : > { %v954_v20 = vpop.permute.xlu1 %953  ;;  %v833_v21 = vpop.permute.xlu0 %832 }
 0x197   : > { %1623 = vmatmul.mubr.msk.bf16.vlgmr.msra.gmra.mxu1 %vm602_vm3, %v2194_v10  ;;  %v959_v22 = vsel %vm602_vm3, %v954_v20, 0 }
 0x198   : > { %1633 = vmatpush3.bf16.xpose.msra.mxu1 %v721_v17  ;;  %1634 = vmatprep.mubr.msk.bf16.mxu1 %vm1951_vm1, %v1950_v2 }
 0x199   : > { %1644 = vmatprep.subr.bf16.mxu1 %v1950_v2 }
 0x19a   : > { %v952_v23 = vpop.permute.xlu0 %951 }
 0x19f   : > { %1635 = vmatmul.mubr.msk.bf16.vlgmr.msra.gmra.mxu1 %vm602_vm3, %v714_v16 }
 0x1a0   : > { %1645 = vmatpush3.bf16.xpose.msra.mxu1 %v840_v19  ;;  %1646 = vmatprep.mubr.msk.bf16.mxu1 %vm1951_vm1, %v1950_v2 }
 0x1a1   : > { %1656 = vmatprep.subr.bf16.mxu1 %v1950_v2 }
 0x1a7   : > { %1647 = vmatmul.mubr.msk.bf16.vlgmr.msra.gmra.mxu1 %vm602_vm3, %v833_v21 }
 0x1a8   : > { %1657 = vmatpush3.bf16.xpose.msra.mxu1 %v959_v22  ;;  %1658 = vmatprep.mubr.msk.bf16.mxu1 %vm1951_vm1, %v1950_v2 }
 0x1a9   : > { %1668 = vmatprep.subr.bf16.mxu1 %v1950_v2 }
 0x1af   : > { %1659 = vmatmul.mubr.msk.bf16.vlgmr.msra.gmra.mxu1 %vm602_vm3, %v952_v23 }
 0x1b0   : > { %1672 = vmatprep.mubr.msk.bf16.mxu1 %vm1951_vm1, %v1950_v2 }
 0x257   : > { %v643_v36 = vpop.f32.mrf.mxu1 }
 0x258   : > { %v644_v37 = vadd.f32 %v643_v36, %v528_v35 }
 0x259   : > { %v1624_v38 = vpop.f32.mrf.mxu1 }
 0x25a   : > { %v649_v39 = vsel %vm602_vm3, %v644_v37, -inf }
 0x25b   : > { %650 = vmax.xlane.f32.xlu1 %v649_v39  ;;  %v646_v40 = vpop.f32.mrf.mxu1 }
 0x25d   : > { %v1625_v41 = vpop.f32.mrf.mxu1 }
 0x25f   : > { %v757_v42 = vpop.f32.mrf.mxu1 }
 0x260   : > { %v758_v43 = vadd.f32 %v757_v42, %v528_v35 }
 0x261   : > { %v1636_v44 = vpop.f32.mrf.mxu1 }
 0x262   : > { %v763_v45 = vsel %vm602_vm3, %v758_v43, -inf }
 0x263   : > { %764 = vmax.xlane.f32.xlu0 %v763_v45  ;;  %v760_v46 = vpop.f32.mrf.mxu1 }
 0x265   : > { %v1637_v47 = vpop.f32.mrf.mxu1 }
 0x267   : > { %v876_v48 = vpop.f32.mrf.mxu1 }
 0x268   : > { %v877_v49 = vadd.f32 %v876_v48, %v528_v35 }
 0x269   : > { %v1648_v50 = vpop.f32.mrf.mxu1 }
 0x26a   : > { %v882_v51 = vsel %vm602_vm3, %v877_v49, -inf }
 0x26b   : > { %883 = vmax.xlane.f32.xlu0 %v882_v51  ;;  %v879_v52 = vpop.f32.mrf.mxu1 }
 0x26d   : > { %v1649_v53 = vpop.f32.mrf.mxu1 }
 0x26f   : > { %v995_v54 = vpop.f32.mrf.mxu1 }
 0x270   : > { %v996_v55 = vadd.f32 %v995_v54, %v528_v35  ;;  %v1793_v54 = vld [vmem:[%s2148_s10 + $0x8] sm:$0xff]  }
 0x271   : > { %v1660_v56 = vpop.f32.mrf.mxu1  ;;  %1669 = vmatpush3.bf16.msra.mxu1 %v1793_v54 }
 0x272   : > { %v1001_v57 = vsel %vm602_vm3, %v996_v55, -inf  ;;  %1670 = vmatprep.subr.bf16.mxu1 %v1950_v2 }
 0x273   : > { %1002 = vmax.xlane.f32.xlu1 %v1001_v57  ;;  %v998_v58 = vpop.f32.mrf.mxu1  ;;  %v1794_v57 = vld [vmem:[%s2148_s10] sm:$0xff]  }
 0x275   : > { %v1661_v59 = vpop.f32.mrf.mxu1  ;;  %1671 = vmatpush3.bf16.msra.mxu1 %v1794_v57 }
 0x276   : > { %1684 = vmatprep.subr.bf16.mxu1 %v1950_v2 }
 0x2e4   : > { %v651_v60 = vpop.xlane.xlu1 %650 }
 0x2e5   : > { %v652_v61 = vsub.f32 %v644_v37, %v651_v60 }
 0x2e7   : > { %v653_v62 = vmul.f32 1.442695, %v652_v61 }
 0x2e9   : > { %1801 = vpow2.f32 %v653_v62 }
 0x2ec   : > { %v765_v63 = vpop.xlane.xlu0 %764 }
 0x2ed   : > { %v766_v0 = vsub.f32 %v758_v43, %v765_v63 }
 0x2ef   : > { %v767_v1 = vmul.f32 1.442695, %v766_v0 }
 0x2f1   : > { %1803 = vpow2.f32 %v767_v1 }
 0x2f4   : > { %v884_v3 = vpop.xlane.xlu0 %883 }
 0x2f5   : > { %v885_v5 = vsub.f32 %v877_v49, %v884_v3 }
 0x2f6   : > { %v1802_v6 = vpop.eup %1801 }
 0x2f7   : > { %v886_v7 = vmul.f32 1.442695, %v885_v5  ;;  %v655_v8 = vsel %vm602_vm3, %v1802_v6, 0.0 }
 0x2f8   : > { %656 = vadd.xlane.f32.xlu0 %v655_v8  ;;  %v2276_v8 = vld [vmem:[%s2169_s28] sm:$0x3f] }
 0x2f9   : > { %1805 = vpow2.f32 %v886_v7 }
 0x2fc   : > { %v1003_v14 = vpop.xlane.xlu1 %1002 }
 0x2fd   : > { %v1004_v15 = vsub.f32 %v996_v55, %v1003_v14 }
 0x2fe   : > { %v1804_v9 = vpop.eup %1803 }
 0x2ff   : > { %v769_v11 = vsel %vm602_vm3, %v1804_v9, 0.0  ;;  %v1005_v16 = vmul.f32 1.442695, %v1004_v15 }
 0x300   : > { %770 = vadd.xlane.f32.xlu1 %v769_v11 }
 0x301   : > { %1807 = vpow2.f32 %v1005_v16 }
 0x306   : > { %v1806_v12 = vpop.eup %1805 }
 0x307   : > { %v888_v13 = vsel %vm602_vm3, %v1806_v12, 0.0 }
 0x308   : > { %889 = vadd.xlane.f32.xlu0 %v888_v13 }
 0x30e   : > { %v1808_v17 = vpop.eup %1807 }
 0x30f   : > { %v1007_v18 = vsel %vm602_vm3, %v1808_v17, 0.0 }
 0x311   : > { %775 = vrot.lane.b32.xlu1 %v2194_v10, %s1960_s9 }
 0x31e   : > { %661 = vrot.lane.b32.xlu0 %v2194_v10, %s1961_s16 }
 0x322   : > { %1013 = vrot.lane.b32.xlu0 %v2194_v10, %s1962_s22 }
 0x335   : > { %1008 = vadd.xlane.f32.xlu1 %v1007_v18 }
 0x346   : > { %894 = vrot.lane.b32.xlu1 %v2194_v10, %s1963_s27 }
 0x381   : > { %v657_v19 = vpop.xlane.xlu0 %656 }
 0x382   : > { %1809 = vrcp.f32 %v657_v19 }
 0x389   : > { %v771_v20 = vpop.xlane.xlu1 %770 }
 0x38a   : > { %1811 = vrcp.f32 %v771_v20 }
 0x38d   : > { %v776_v27 = vpop.permute.xlu1 %775 }
 0x38e   : > { %v781_v31 = vsel %vm666_vm6, %v776_v27, 0  ;;  %v1151_v27 = vsub.s32 1, %v2225_v25 }
 0x38f   : > { %v1810_v21 = vpop.eup %1809 }
 0x390   : > { %v659_v23 = vmul.f32 %v1810_v21, %v1802_v6 }
 0x391   : > { %v890_v22 = vpop.xlane.xlu0 %889 }
 0x392   : > { %v660_v29 = vpack.c.bf16 %v659_v23, %v659_v23  ;;  %1813 = vrcp.f32 %v890_v22  ;;  %v1795_v23 = vld [vmem:[%s2153_s26 + $0x8] sm:$0xff]  }
 0x395   : > { %v662_v24 = vpop.permute.xlu0 %661 }
 0x396   : > { %v668_v26 = vsel %vm666_vm6, %v662_v24, 0 }
 0x397   : > { %1627 = vmatpush3.bf16.msra.mxu0 %v668_v26  ;;  %v1812_v30 = vpop.eup %1811 }
 0x398   : > { %1638 = vmatprep.subr.bf16.mxu0 %v1950_v2  ;;  %v773_v10 = vmul.f32 %v1812_v30, %v1804_v9  ;;  %v1078_v9 = vrot.slane %v2276_v8, %v514_v28  ;;  %v1796_v28 = vld [vmem:[%s2153_s26] sm:$0xff]   ;;  %v1152_v30 = vrot.slane %v2276_v8, %v1151_v27 }
 0x399   : > { %v1014_v38 = vpop.permute.xlu0 %1013 }
 0x39a   : > { %1629 = vmatmul.mubr.msk.bf16.vlgmr.msra.gmra.mxu0 %vm602_vm3, %v660_v29  ;;  %v774_v32 = vpack.c.bf16 %v773_v10, %v773_v10  ;;  %v1019_v40 = vsel %vm666_vm6, %v1014_v38, 0  ;;  %v1156_v29 = vsub.s32 2, %v2225_v25  ;;  %v1799_v38 = vld [vmem:[%s2164_s0 + $0x8] sm:$0xff]  }
 0x39b   : > { %1639 = vmatpush3.bf16.msra.mxu0 %v781_v31  ;;  %1640 = vmatprep.mubr.msk.bf16.mxu0 %vm1951_vm1, %v1950_v2 }
 0x39c   : > { %1650 = vmatprep.subr.bf16.mxu0 %v1950_v2 }
 0x39f   : > { %v1814_v33 = vpop.eup %1813 }
 0x3a0   : > { %v892_v35 = vmul.f32 %v1814_v33, %v1806_v12 }
 0x3a2   : > { %1641 = vmatmul.mubr.msk.bf16.vlgmr.msra.gmra.mxu0 %vm602_vm3, %v774_v32  ;;  %v893_v39 = vpack.c.bf16 %v892_v35, %v892_v35  ;;  %v1157_v32 = vrot.slane %v2276_v8, %v1156_v29 }
 0x3a3   : > { %1652 = vmatprep.mubr.msk.bf16.mxu0 %vm1951_vm1, %v1950_v2 }
 0x3be   : > { %v1009_v34 = vpop.xlane.xlu1 %1008 }
 0x3bf   : > { %1815 = vrcp.f32 %v1009_v34 }
 0x3c2   : > { %v895_v36 = vpop.permute.xlu1 %894 }
 0x3c3   : > { %v900_v37 = vsel %vm666_vm6, %v895_v36, 0  ;;  %v1797_v36 = vld [vmem:[%s2164_s0 + $0x18] sm:$0xff]  }
 0x3c4   : > { %1651 = vmatpush3.bf16.msra.mxu0 %v900_v37  ;;  %v1798_v37 = vld [vmem:[%s2164_s0 + $0x10] sm:$0xff]  }
 0x3c5   : > { %1662 = vmatprep.subr.bf16.mxu0 %v1950_v2 }
 0x3c7   : > { %1653 = vmatmul.mubr.msk.bf16.vlgmr.msra.gmra.mxu0 %vm602_vm3, %v893_v39  ;;  %v1800_v39 = vld [vmem:[%s2164_s0] sm:$0xff]  }
 0x3c8   : > { %1663 = vmatpush3.bf16.msra.mxu0 %v1019_v40  ;;  %1664 = vmatprep.mubr.msk.bf16.mxu0 %vm1951_vm1, %v1950_v2  ;;  %v1561_v40 = vld [vmem:[%s489_s24] ss:$0 sm:$0xff] }
 0x3c9   : > { %1676 = vmatprep.subr.bf16.mxu0 %v1950_v2 }
 0x3cc   : > { %v1816_v41 = vpop.eup %1815 }
 0x3cd   : > { %v1011_v42 = vmul.f32 %v1816_v41, %v1808_v17 }
 0x3cf   : > { %v1012_v43 = vpack.c.bf16 %v1011_v42, %v1011_v42 }
 0x3d1   : > { %1665 = vmatmul.mubr.msk.bf16.vlgmr.msra.gmra.mxu0 %vm602_vm3, %v1012_v43 }
 0x3d2   : > { %1680 = vmatprep.mubr.msk.bf16.mxu0 %vm1951_vm1, %v1950_v2  ;;  %1677 = vmatpush3.bf16.msra.mxu0 %v1795_v23 }
 0x3d3   : > { %1678 = vmatprep.subr.bf16.mxu0 %v1950_v2 }
 0x3d6   : > { %1679 = vmatpush3.bf16.msra.mxu0 %v1796_v28 }
 0x45a   : > { %v704_v44 = vpop.f32.mrf.mxu0 }
 0x45b   : > { %v710_v45 = vpack.c.bf16 %v704_v44, %v704_v44 }
 0x45c   : > { %v1630_v46 = vpop.f32.mrf.mxu0 }
 0x45d   : > { %712 = vst.msk [vmem:[#allocation3] sm:$0xf] %vm711_vm7, %v710_v45 }
 0x45e   : > { %v707_v47 = vpop.f32.mrf.mxu0 }
 0x460   : > { %v1631_v48 = vpop.f32.mrf.mxu0 }
 0x462   : > { %v817_v49 = vpop.f32.mrf.mxu0 }
 0x463   : > { %v1579_v50 = vpack.c.bf16 %v817_v49, %v817_v49 }
 0x464   : > { %v1642_v51 = vpop.f32.mrf.mxu0 }
 0x465   : > { %827 = vrot.lane.b32.xlu1 %v1579_v50, %s1964_s18  ;;  %v1242_v51 = vsub.s32 3, %v2225_v25 }
 0x466   : > { %v820_v52 = vpop.f32.mrf.mxu0 }
 0x467   : > { %v1243_v52 = vrot.slane %v2276_v8, %v1242_v51 }
 0x468   : > { %v1643_v53 = vpop.f32.mrf.mxu0 }
 0x487   : > { %v936_v55 = vpop.f32.mrf.mxu0 }
 0x488   : > { %v1580_v56 = vpack.c.bf16 %v936_v55, %v936_v55 }
 0x489   : > { %v1654_v58 = vpop.f32.mrf.mxu0 }
 0x48a   : > { %946 = vrot.lane.b32.xlu0 %v1580_v56, %s1965_s23 }
 0x48b   : > { %v939_v59 = vpop.f32.mrf.mxu0 }
 0x48d   : > { %v1655_v60 = vpop.f32.mrf.mxu0 }
 0x491   : > { %v1055_v61 = vpop.f32.mrf.mxu0 }
 0x492   : > { %v1581_v62 = vpack.c.bf16 %v1055_v61, %v1055_v61 }
 0x493   : > { %v1666_v63 = vpop.f32.mrf.mxu0 }
 0x494   : > { %1065 = vrot.lane.b32.xlu1 %v1581_v62, %s1966_s21 }
 0x495   : > { %v1058_v0 = vpop.f32.mrf.mxu0 }
 0x497   : > { %v1667_v1 = vpop.f32.mrf.mxu0 }
 0x4d7   : > { %v828_v3 = vpop.permute.xlu1 %827 }
 0x4d8   : > { %831 = vst.msk [vmem:[#allocation3] sm:$0xf] %vm830_vm8, %v828_v3 }
 0x4fc   : > { %v947_v5 = vpop.permute.xlu0 %946 }
 0x4fd   : > { %950 = vst.msk [vmem:[#allocation3] sm:$0xf] %vm949_vm9, %v947_v5 }
 0x506   : > { %v1066_v6 = vpop.permute.xlu1 %1065 }
 0x507   : > { %1069 = vst.msk [vmem:[#allocation3] sm:$0xf] %vm1068_vm10, %v1066_v6  ;;  %v1328_v6 = vsub.s32 4, %v2225_v25 }
 0x50e   : > { %v1070_v7 = vld [vmem:[#allocation3] sm:$0xf] }
 0x50f   : > { %1673 = vmatmul.mubr.msk.bf16.vlgmr.msra.gmra.mxu1 %vm554_vm2, %v1070_v7  ;;  %v1333_v7 = vsub.s32 5, %v2225_v25 }
 0x510   : > { %1692 = vmatprep.mubr.msk.bf16.mxu1 %vm1951_vm1, %v1950_v2  ;;  %1685 = vmatpush3.bf16.msra.mxu1 %v1797_v36 }
 0x511   : > { %1686 = vmatprep.subr.bf16.mxu1 %v1950_v2 }
 0x514   : > { %1687 = vmatpush3.bf16.msra.mxu1 %v1798_v37 }
 0x515   : > { %1688 = vmatprep.subr.bf16.mxu1 %v1950_v2 }
 0x518   : > { %1689 = vmatpush3.bf16.msra.mxu1 %v1799_v38 }
 0x519   : > { %1690 = vmatprep.subr.bf16.mxu1 %v1950_v2 }
 0x51c   : > { %1691 = vmatpush3.bf16.msra.mxu1 %v1800_v39 }
 0x5cf   : > { %v1128_v11 = vpop.f32.mrf.mxu1 }
 0x5d0   : > { %v1129_v12 = vadd.f32 %v1128_v11, %v1078_v9  ;;  %v1329_v9 = vrot.slane %v2276_v8, %v1328_v6 }
 0x5d1   : > { %v1674_v13 = vpop.f32.mrf.mxu1 }
 0x5d2   : > { %v1134_v14 = vadd.f32 %v1129_v12, %v2178_v4  ;;  %v1334_v12 = vrot.slane %v2276_v8, %v1333_v7 }
 0x5d3   : > { %v1131_v15 = vpop.f32.mrf.mxu1 }
 0x5d4   : > { %v1135_v16 = vsel %vm554_vm2, %v1134_v14, 0.0 }
 0x5d5   : > { %1136 = vadd.xlane.f32.xlu0 %v1135_v16  ;;  %v1675_v17 = vpop.f32.mrf.mxu1 }
 0x65e   : > { %v1137_v18 = vpop.xlane.xlu0 %1136 }
 0x65f   : > { %v1139_v19 = vmul.f32 0.03125, %v1137_v18 }
 0x661   : > { %v1140_v20 = vsub.f32 %v1134_v14, %v1139_v19 }
 0x663   : > { %v1141_v21 = vmul.f32 %v1140_v20, %v1140_v20 }
 0x665   : > { %v1142_v22 = vsel %vm554_vm2, %v1141_v21, 0.0 }
 0x666   : > { %1143 = vadd.xlane.f32.xlu1 %v1142_v22 }
 0x6ef   : > { %v1144_v4 = vpop.xlane.xlu1 %1143 }
 0x6f0   : > { %v1145_v24 = vmul.f32 0.03125, %v1144_v4 }
 0x6f2   : > { %v1146_v26 = vadd.f32 1e-05, %v1145_v24 }
 0x6f4   : > { %1817 = vrsqrt.f32 %v1146_v26 }
 0x701   : > { %v1818_v31 = vpop.eup %1817 }
 0x702   : > { %v1148_v10 = vmul.f32 %v1818_v31, %v1140_v20 }
 0x704   : > { %v1153_v33 = vmul.f32 %v1152_v30, %v1148_v10 }
 0x706   : > { %v1158_v34 = vadd.f32 %v1157_v32, %v1153_v33 }
 0x708   : > { %v1159_v35 = vpack.c.bf16 %v1158_v34, %v1158_v34 }
 0x70a   : > { %1681 = vmatmul.mubr.msk.bf16.vlgmr.msra.gmra.mxu0 %vm554_vm2, %v1159_v35 }
 0x7ca   : > { %v1220_v41 = vpop.f32.mrf.mxu0 }
 0x7cb   : > { %v1221_v42 = vadd.f32 %v1561_v40, %v1220_v41 }
 0x7cc   : > { %v1682_v43 = vpop.f32.mrf.mxu0 }
 0x7cd   : > { %v1227_v44 = vmul.f32 0.70710677, %v1221_v42  ;;  %v1226_v48 = vmul.f32 0.5, %v1221_v42 }
 0x7ce   : > { %v1223_v45 = vpop.f32.mrf.mxu0 }
 0x7cf   : > { %1819 = verf.f32 %v1227_v44 }
 0x7d0   : > { %v1683_v46 = vpop.f32.mrf.mxu0 }
 0x7dc   : > { %v1820_v47 = vpop.eup %1819 }
 0x7dd   : > { %v1229_v49 = vadd.f32 1.0, %v1820_v47 }
 0x7df   : > { %v1230_v50 = vmul.f32 %v1229_v49, %v1226_v48 }
 0x7e1   : > { %v1231_v2 = vpack.c.bf16 %v1230_v50, %v1230_v50 }
 0x7e3   : > { %1693 = vmatmul.mubr.msk.bf16.vlgmr.msra.gmra.mxu1 %vm1268_vm11, %v1231_v2 }
 0x8a3   : > { %v1306_v53 = vpop.f32.mrf.mxu1 }
 0x8a4   : > { %v1307_v54 = vadd.f32 %v1306_v53, %v1243_v52 }
 0x8a5   : > { %v1694_v55 = vpop.f32.mrf.mxu1 }
 0x8a6   : > { %v1312_v56 = vadd.f32 %v1307_v54, %v1158_v34 }
 0x8a7   : > { %v1309_v57 = vpop.f32.mrf.mxu1 }
 0x8a8   : > { %v1313_v58 = vsel %vm554_vm2, %v1312_v56, 0.0 }
 0x8a9   : > { %1314 = vadd.xlane.f32.xlu0 %v1313_v58  ;;  %v1695_v59 = vpop.f32.mrf.mxu1 }
 0x932   : > { %v1315_v60 = vpop.xlane.xlu0 %1314 }
 0x933   : > { %v1316_v61 = vmul.f32 0.03125, %v1315_v60 }
 0x935   : > { %v1317_v62 = vsub.f32 %v1312_v56, %v1316_v61 }
 0x937   : > { %v1318_v63 = vmul.f32 %v1317_v62, %v1317_v62 }
 0x939   : > { %v1319_v0 = vsel %vm554_vm2, %v1318_v63, 0.0 }
 0x93a   : > { %1320 = vadd.xlane.f32.xlu0 %v1319_v0 }
 0x9c3   : > { %v1321_v1 = vpop.xlane.xlu0 %1320 }
 0x9c4   : > { %v1322_v3 = vmul.f32 0.03125, %v1321_v1 }
 0x9c6   : > { %v1323_v5 = vadd.f32 1e-05, %v1322_v3 }
 0x9c8   : > { %1821 = vrsqrt.f32 %v1323_v5 }
 0x9d5   : > { %v1822_v11 = vpop.eup %1821 }
 0x9d6   : > { %v1325_v13 = vmul.f32 %v1822_v11, %v1317_v62 }
 0x9d8   : > { %v1330_v14 = vmul.f32 %v1329_v9, %v1325_v13  ;;  %1340 = sbr.rel (%p1570_p2) target bundleno = 2526 (0x9de), region = 68 }
 0x9da   : > { %v1335_v15 = vadd.f32 %v1334_v12, %v1330_v14 }
 0x9dc   : > { %1336 = vst.msk [vmem:[#allocation2] sm:$0xff] %vm554_vm2, %v1335_v15 }
 0x9dd   : > { %1341 = vst.msk [vmem:[%s2171_s2] sm:$0xff] %vm554_vm2, %v1335_v15 }
 0x9de PF: > { %s2409_s24 = sld [smem:[#allocation21_spill]]  ;;  %s1572_s0 = sshll.u32 %s1935_s13, 7 }
 0x9df   : > { %s2411_s20 = sld [smem:[#allocation24_spill]]  ;;  %s1356_s19 = sshll.u32 %s2171_s2, 4  ;;  %s1357_s19 = int_to_ptr.vmem [resolvable:$true] %s1356_s19 }
 0x9e0   : > { %s1851_s29 = scalar_lea.vmem %s1357_s19, 128  ;;  %s1967_s12 = smov [#allocation7]  }
 0x9e1   : > { %p1852_p4 = scmp.ne.s32.totalorder %s1357_s19, %s1851_s29  ;;  %s1855_s11 = sshll.u32 %s1967_s12, 4  ;;  %s1856_s11 = int_to_ptr.vmem [resolvable:$false] %s1855_s11 }
 0x9e2   : > { %s1857_s15 = scalar_lea.vmem %s1856_s11, 256  ;;  %p1858_p7 = scmp.lt.s32.totalorder %s1357_s19, %s1856_s11 }
 0x9e3   : > { %p1853_p5 = pnand %p1852_p4, %p2081_p10  ;;  %p1859_p8 = scmp.lt.s32.totalorder %s1857_s15, %s1851_s29 }
 0x9e4   : > { %s1343_s17 = scalar_lea.sflag [#allocation6], %s2409_s24 }
 0x9e5   : > { %s1354_s25 = scalar_lea.hbm %s2411_s20, %s1572_s0  ;;  %p1854_p6 = pneg %p1853_p5 }
 0x9e6   : > { %p1860_p12 = por %p1859_p8, %p1858_p7 }
 0x9e8   : > { %p1861_p3 = pnand %p1860_p12, %p1854_p6 }
 0x9ea   : > { %1864 = shalt.err (!%p1861_p3)
}
 0x9eb   : > { %s1865_s13 = scalar_lea.hbm %s1354_s25, 128  ;;  %s1869_s16 = scalar_lea.hbm %s2411_s20, 256 }
 0x9ec   : > { %p1866_p13 = scmp.ne.s32.totalorder %s1354_s25, %s1865_s13  ;;  %p1870_p9 = scmp.lt.s32.totalorder %s1354_s25, %s2411_s20 }
 0x9ed   : > { %p1871_p1 = scmp.lt.s32.totalorder %s1869_s16, %s1865_s13 }
 0x9ee   : > { %p1867_p0 = pnand %p1866_p13, %p2081_p10 }
 0x9ef   : > { %p1872_p2 = por %p1871_p1, %p1870_p9 }
 0x9f0   : > { %p1868_p11 = pneg %p1867_p0 }
 0x9f2   : > { %p1873_p4 = pnand %p1872_p2, %p1868_p11 }
 0x9f4   : > { %1876 = shalt.err (!%p1873_p4)
}
 0x9f5   : > { %1698 = dma.vmem_to_hbm [thread:$0]  (%p2081_p10), %s1357_s19, 128, %s1354_s25, %s1343_s17  }
 0x9f6 PF: > { %s2412_s18 = sld [smem:[#allocation15_spill]] }
 0x9f7   : > { %s2413_s23 = sld [smem:[#allocation10_spill]] }
 0x9f8   : > { %s2414_s21 = sld [smem:[#allocation19_spill]] }
 0x9fc   : > { %p1709_p5 = scmp.ge.s32.totalorder %s2412_s18, 2 }
 0x9fd   : > { %s1368_s10 = sand.u32 1, %s2413_s23  }
 0x9fe   : > { %p2415_p6 = scmp.ne.s32.totalorder %s2414_s21, 0  ;;  %s1369_s26 = scalar_lea.sflag [#allocation6], %s1368_s10 }
 0xa00   : > { %p1705_p7 = pnand %p1709_p5, %p2415_p6 }
 0xa02   : > { %p1706_p8 = pneg %p1705_p7 }
 0xa04   : > { %1914 = dma.done.wait (%p1706_p8), %s1369_s26, 128  }
 0xa05   : > { %1916 = vsyncadd (%p1706_p8), %s1369_s26, 4294967168  ;;  %s25_s16 = sadd.s32 1, %s2412_s18   ;;  %s2416_s30 = sld [smem:[#allocation11_spill]] }
 0xa06   : > { %p22_p12 = scmp.ge.s32.totalorder %s25_s16, 6   ;;  %s2417_s10 = sld [smem:[#allocation12_spill]] }
 0xa07   : > { %s2418_s11 = sld [smem:[#allocation20_spill]] }
 0xa08   : > { %s2419_s12 = sld [smem:[#allocation13_spill]]  ;;  %24 = sbr.rel (!%p22_p12) target bundleno = 11 (0xb), region = 133 }
 0xa09   : > { %s2420_s13 = sld [smem:[#allocation14_spill]] }
 0xa0a   : > { %s2421_s14 = sld [smem:[#allocation16_spill]] }
 0xa0b   : > { %s2422_s15 = sld [smem:[#allocation17_spill]] }
 0xa0d   :  { %1374 = vsyncpa [#allocation5], 1 }
 0xa0e   :  { %1376 = vsyncpa [#allocation5 + $0x1], 1 }
 0xa0f   :  { %1377 = vsyncpa [#allocation6], 1 }
 0xa10   :  { %1379 = vsyncpa [#allocation6 + $0x1], 1 }

</bundles_post_ra>
